<compile_context>
chip_gen: v7x
topology: tpu7x:2x2x1
jax: 0.10.0
libtpu: 0.0.40
codegen_flags: <defaults>
</compile_context>

<pallas_src>
import numpy as np
import jax
import jax.numpy as jnp
from jax.experimental import pallas as pl
from jax.experimental.pallas import tpu as pltpu

_LANES = 128
_MAX_TILE_ROWS = 2048          # ~1 MiB f32 block; 2x in + 2x out buffers ~= 4 MiB VMEM
_VMEM_LIMIT_BYTES = 32 * 1024 * 1024   # explicit budget, safe on v5e/v6e/v7x


def _copy_kernel(x_ref, o_ref):
    # Single full-lane tile copy per grid step (unmasked vst, VPU-trivial,
    # HBM-bandwidth bound).
    o_ref[...] = x_ref[...]


def _min_sublane_tile(dtype) -> int:
    # Natural sublane packing unit: 8 for 32-bit, 16 for bf16, 32 for int8.
    itemsize = jnp.dtype(dtype).itemsize
    return max(8, 32 // itemsize)


def _choose_tile_rows(rows: int, dtype) -> int:
    min_tile = _min_sublane_tile(dtype)
    t = _MAX_TILE_ROWS
    while t >= min_tile:
        if rows % t == 0:
            return t
        t //= 2
    # Tiny / ragged row counts: fall back to one whole-array block
    # (block_shape equal to the full array dims is always legal).
    return rows


def pallas_identity(x: jax.Array) -> jax.Array:
    """Tiled, lane-dense, in-place pass-through Pallas copy kernel.

    Requires x.size to be a multiple of 128 (lane width) so the array maps to
    a (rows, 128) slab with no padding.  Tiled over rows with a "parallel"
    grid so large slabs stay within scoped VMEM on every TPU generation and
    the copy is sharded across both TensorCores on v7x.
    """
    if x.size % _LANES != 0:
        raise ValueError(
            f"pallas_identity requires size % {_LANES} == 0, got size={x.size}"
        )
    orig_shape = x.shape
    rows = x.size // _LANES
    x2d = x.reshape(rows, _LANES)  # layout no-op for contiguous arrays under jit

    tile_rows = _choose_tile_rows(rows, x.dtype)
    grid = (rows // tile_rows,)

    y2d = pl.pallas_call(
        _copy_kernel,
        out_shape=jax.ShapeDtypeStruct((rows, _LANES), x.dtype),
        grid=grid,
        in_specs=[pl.BlockSpec((tile_rows, _LANES), lambda i: (i, 0))],
        out_specs=pl.BlockSpec((tile_rows, _LANES), lambda i: (i, 0)),
        input_output_aliases={0: 0},  # HBM in-place: no fresh output buffer
        compiler_params=pltpu.CompilerParams(
            dimension_semantics=("parallel",),   # v7x: shard rows across 2 TCs
            vmem_limit_bytes=_VMEM_LIMIT_BYTES,  # explicit, generation-safe budget
        ),
    )(x2d)

    return y2d.reshape(orig_shape)


def xlstm_block_forward(X: jax.Array):
    """Exact semantic port of xLSTM_block.forward.

    The PyTorch forward has an empty body and returns None; there is no
    computation to run, so no Pallas kernel is launched on the hot path.
    """
    del X
    return None


if __name__ == "__main__":
    key = jax.random.PRNGKey(0)
    # Small NCHW input consistent with a generic block interface.
    # 2*4*16*16 = 2048 elements -> exactly 16 lane-dense rows of 128.
    x = jax.random.normal(key, (2, 4, 16, 16), dtype=jnp.float32)

    # Host-side reference copy taken BEFORE donation invalidates x.
    x_host = np.asarray(jax.device_get(x))

    # Exact-semantics forward: returns None, like the PyTorch module.
    out = xlstm_block_forward(x)
    assert out is None

    # Demonstration kernel: jit + donate so input_output_aliases holds
    # end-to-end (no defensive copy, no fresh HBM buffer).
    identity = jax.jit(pallas_identity, donate_argnums=0)
    y = identity(x)
    jax.block_until_ready(y)

    # Sanity: pass-through reproduces the input exactly, dtype unchanged.
    assert y.shape == x_host.shape and y.dtype == x_host.dtype
    assert np.array_equal(np.asarray(jax.device_get(y)), x_host)

    print("KERNEL_OK")
</pallas_src>

<mosaic_0001>
module attributes {stable_mosaic.version = 11 : i64} {
  func.func @_copy_kernel(%arg0: i32, %arg1: memref<16x128xf32, #tpu.memory_space<vmem>>, %arg2: memref<16x128xf32, #tpu.memory_space<vmem>>) attributes {dimension_semantics = [#tpu.dimension_semantics<parallel>], iteration_bounds = array<i64: 1>, scalar_prefetch = 0 : i64, scratch_operands = 0 : i64, tpu.core_type = #tpu.core_type<tc>, window_params = [{transform_indices = @transform_0, window_bounds = array<i64: 16, 128>}, {transform_indices = @transform_1, window_bounds = array<i64: 16, 128>}]} {
    %c0 = arith.constant 0 : index
    %c0_0 = arith.constant 0 : index
    %0 = vector.load %arg1[%c0, %c0_0] : memref<16x128xf32, #tpu.memory_space<vmem>>, vector<16x128xf32>
    %c0_1 = arith.constant 0 : index
    %c0_2 = arith.constant 0 : index
    %1 = vector.load %arg2[%c0_1, %c0_2] : memref<16x128xf32, #tpu.memory_space<vmem>>, vector<16x128xf32>
    tpu.vector_store %arg2[%c0_1, %c0_2], %0 {strides = array<i32>} : memref<16x128xf32, #tpu.memory_space<vmem>>, vector<16x128xf32>,
    return
  }
  func.func @transform_0(%arg0: i32) -> (i32, i32) {
    %c0_i32 = arith.constant 0 : i32
    %c0_i32_0 = arith.constant 0 : i32
    return %arg0, %c0_i32 : i32, i32
  }
  func.func @transform_1(%arg0: i32) -> (i32, i32) {
    %c0_i32 = arith.constant 0 : i32
    %c0_i32_0 = arith.constant 0 : i32
    return %arg0, %c0_i32 : i32, i32
  }
}

</mosaic_0001>

<bundles_post_ra>
// kernel: pallas_identity.1
= control target key start
LH: loop header
LB: loop body
LE: loop exit
PB: predicated region body
PF: predicated region fallthrough
CT: control target
= control target key end

     0   :  { %s38_s0 = inlined_call_operand.vmem [shape: f32[16,128], index: 0, kind: input, shape index: {}, may-alias: {0,1}]   ;;  %s39_s1 = inlined_call_operand.vmem [shape: f32[16,128], index: 1, kind: output, shape index: {}, may-alias: {0,1}]  }
   0x1   :  { %v8_v0 = vld [vmem:[%s38_s0] sm:$0xff]  ;;  %v9_v1 = vld [vmem:[%s38_s0 + $0x8] sm:$0xff] }
   0x2   :  { %10 = vst [vmem:[%s39_s1] sm:$0xff] %v8_v0  ;;  %11 = vst [vmem:[%s39_s1 + $0x8] sm:$0xff] %v9_v1 }

</bundles_post_ra>
